<compile_context>
chip_gen: v6e
topology: v6e:2x2x1
jax: 0.10.0
libtpu: 0.0.40
codegen_flags: <defaults>
</compile_context>

<pallas_src>
import jax
import jax.numpy as jnp
from jax.experimental import pallas as pl
from jax.experimental.pallas import tpu as pltpu

GROUPS = 32
EPS = 1e-5


def _auto_elementwise_dtype():
    # v6e / v7x VPU+EUP are bf16-native; v5e and older are not (bf16 would be emulated).
    try:
        kind = jax.devices()[0].device_kind.lower()
    except Exception:
        return jnp.float32
    for old in ("v2", "v3", "v4", "v5"):
        if old in kind:
            return jnp.float32
    return jnp.bfloat16


def _make_kernel(H, W, Cin, Cout_p, nb, conv_dtype, ew_dtype):
    HW = H * W

    def shift_lanes(x, off):
        # z[:, p] = x[:, p + off] for 0 <= p + off < HW, zero otherwise.
        # Static slice + concat-with-zeros: a single lane shift on the XLU, with the
        # out-of-image rows (dy boundary) zero-filled for free, so only the
        # W-boundary (dx) masks remain.
        if off == 0:
            return x
        c = x.shape[0]
        if off > 0:
            return jnp.concatenate(
                [x[:, off:], jnp.zeros((c, off), x.dtype)], axis=1)
        return jnp.concatenate(
            [jnp.zeros((c, -off), x.dtype), x[:, :HW + off]], axis=1)

    def kernel(x_ref, gamma_ref, beta_ref, pmat_ref, w_ref, bias_ref, o_ref):
        # x_ref:      (nb, Cin, H*W)     channels on sublanes, pixels on lanes
        # gamma/beta: (Cin, 1)           GroupNorm affine parameters
        # pmat_ref:   (Cin, Cin)         within-group averaging matrix (1/(H*W*cg))
        # w_ref:      (9*Cout_p, Cin)    conv weight, row = t*Cout_p + co, t = dy*3+dx
        # bias_ref:   (Cout_p, 1)        conv bias (zero-padded channels)
        # o_ref:      (nb, Cout_p, H*W)  lane-dense output, native NCHW layout
        gamma = gamma_ref[...]
        beta = beta_ref[...]
        pmat = pmat_ref[...]
        w_cat = w_ref[...]
        bias_full = jnp.broadcast_to(bias_ref[...], (Cout_p, HW))  # hoisted once

        # ---- GroupNorm (single-pass f32 stats, off the MXU) + SiLU ----------------
        slabs = []
        for b in range(nb):                       # nb is small: static unroll is fine
            x_f = x_ref[b].astype(jnp.float32)    # (Cin, HW)
            s1 = jnp.sum(x_f, axis=1, keepdims=True)          # (Cin, 1)
            s2 = jnp.sum(x_f * x_f, axis=1, keepdims=True)    # (Cin, 1)
            g = jnp.dot(pmat, jnp.concatenate([s1, s2], axis=1),
                        preferred_element_type=jnp.float32)   # (Cin, 2) per-group stats
            mean = g[:, 0:1]
            var = g[:, 1:2] - mean * mean          # f32 single-pass variance
            scale = jax.lax.rsqrt(var + EPS) * gamma
            shift = beta - mean * scale            # mean folded into the affine
            xn = (x_f.astype(ew_dtype) * scale.astype(ew_dtype)
                  + shift.astype(ew_dtype))
            a = xn * jax.nn.sigmoid(xn)            # SiLU (EUP)
            slabs.append(a.astype(conv_dtype))
        a_all = jnp.concatenate(slabs, axis=1) if nb > 1 else slabs[0]  # (Cin, nb*HW)

        # ---- 3x3 conv: one MXU matmul, 9 taps on rows, batch block on lanes -------
        y = jnp.dot(w_cat, a_all,
                    preferred_element_type=jnp.float32)   # (9*Cout_p, nb*HW), f32 acc

        # ---- tap combine: lane shifts + W-boundary masks, register accumulation ---
        # out[co, p] = sum_{dy,dx} y[(dy*3+dx)*Cout_p + co, p + (dy-1)*W + (dx-1)]
        lane_w = jax.lax.broadcasted_iota(jnp.int32, (1, HW), 1) % W
        mask_l = lane_w >= 1          # source column w-1 inside the image
        mask_r = lane_w <= W - 2      # source column w+1 inside the image

        for b in range(nb):
            yb = y[:, b * HW:(b + 1) * HW]                     # (9*Cout_p, HW)
            acc = yb[4 * Cout_p:5 * Cout_p, :] + bias_full     # center tap; no zero fill
            for dy in range(3):
                for dx in range(3):
                    if (dy, dx) == (1, 1):
                        continue
                    t = dy * 3 + dx
                    off = (dy - 1) * W + (dx - 1)
                    tap = yb[t * Cout_p:(t + 1) * Cout_p, :]   # sublane-aligned slab
                    z = shift_lanes(tap, off)
                    if dx == 0:
                        z = jnp.where(mask_l, z, 0.0)
                    elif dx == 2:
                        z = jnp.where(mask_r, z, 0.0)
                    acc = acc + z
            o_ref[b] = acc.astype(o_ref.dtype)                 # single lane-dense store

    return kernel


def unet_output_layer(x_nchw, gamma, beta, w_oihw, bias, *,
                      conv_dtype=jnp.bfloat16, elementwise_dtype=None,
                      batch_block=None):
    """GroupNorm(32) -> SiLU -> Conv2d(3x3, pad=1).  (N, Cin, H, W) -> (N, Cout, H, W).

    conv_dtype:        MXU input dtype for the conv matmul (accumulation is always f32).
    elementwise_dtype: dtype for normalize/SiLU; None = bf16 on v6e/v7x, f32 on v5e
                       and older (GroupNorm statistics are always computed in f32).
    batch_block:       images per grid step; None = auto (fused matmul lane extent
                       >= ~512 while keeping >= 2 grid steps whenever N >= 2).
    """
    N, Cin, H, W = x_nchw.shape
    Cout = w_oihw.shape[0]
    assert Cin % GROUPS == 0, "GroupNorm(32) needs Cin % 32 == 0"
    HW = H * W
    ew_dtype = (elementwise_dtype if elementwise_dtype is not None
                else _auto_elementwise_dtype())

    # Pad Cout to a multiple of 8 so every tap slab of the matmul output starts on a
    # sublane-group boundary (slab slicing is then free).  Padding is stripped below.
    Cout_p = ((Cout + 7) // 8) * 8

    # Activations stay in the native NCHW layout: free reshape, no transposes anywhere.
    x_flat = x_nchw.reshape(N, Cin, HW)

    # Conv weight: OIHW (Cout, Cin, 3, 3) -> (9*Cout_p, Cin), row = t*Cout_p + co.
    w_t = jnp.transpose(w_oihw, (2, 3, 0, 1)).reshape(9, Cout, Cin)
    if Cout_p != Cout:
        w_t = jnp.pad(w_t, ((0, 0), (0, Cout_p - Cout), (0, 0)))
    w_cat = w_t.reshape(9 * Cout_p, Cin).astype(conv_dtype)

    bias_col = bias.reshape(Cout, 1).astype(jnp.float32)
    if Cout_p != Cout:
        bias_col = jnp.pad(bias_col, ((0, Cout_p - Cout), (0, 0)))

    # Within-group averaging matrix: pmat[i, j] = 1/(H*W*cg) iff same group.
    cg = Cin // GROUPS
    grp = jnp.arange(Cin) // cg
    pmat = (grp[:, None] == grp[None, :]).astype(jnp.float32) / float(HW * cg)

    gamma_col = gamma.reshape(Cin, 1).astype(jnp.float32)
    beta_col = beta.reshape(Cin, 1).astype(jnp.float32)

    # Batch block: fused conv-matmul lane extent nb*H*W >= ~512, but keep >= 2 grid
    # steps whenever N >= 2 so both v7x TensorCores get work.
    if batch_block is None:
        nb = max(1, min(N, -(-512 // HW)))
        while N % nb:
            nb -= 1
        if N >= 2:
            nb = min(nb, N // 2)
            while N % nb:
                nb -= 1
    else:
        nb = batch_block
    assert N % nb == 0, "batch_block must divide N"

    # Explicit scoped-VMEM limit: double-buffered x/out blocks + params + f32
    # temporaries, capped just under the queried physical VMEM (v7x has only 64 MiB).
    x_bytes = nb * Cin * HW * x_flat.dtype.itemsize
    out_bytes = nb * Cout_p * HW * x_flat.dtype.itemsize
    param_bytes = (Cin * Cin + 9 * Cout_p * Cin + 3 * Cin + Cout_p) * 4
    temp_bytes = 6 * nb * HW * max(Cin, 9 * Cout_p) * 4
    est = 2 * (x_bytes + out_bytes) + param_bytes + temp_bytes
    try:
        cap = int(pltpu.get_tpu_info().vmem_capacity_bytes)
    except Exception:
        cap = 64 * 1024 * 1024
    vmem_limit = int(min(max(est, 32 * 1024 * 1024), cap - 8 * 1024 * 1024))

    kernel = _make_kernel(H, W, Cin, Cout_p, nb, conv_dtype, ew_dtype)

    out_flat = pl.pallas_call(
        kernel,
        out_shape=jax.ShapeDtypeStruct((N, Cout_p, HW), x_nchw.dtype),
        grid_spec=pltpu.PrefetchScalarGridSpec(
            num_scalar_prefetch=0,
            grid=(N // nb,),
            in_specs=[
                pl.BlockSpec((nb, Cin, HW), lambda n: (n, 0, 0)),
                pl.BlockSpec((Cin, 1), lambda n: (0, 0)),
                pl.BlockSpec((Cin, 1), lambda n: (0, 0)),
                pl.BlockSpec((Cin, Cin), lambda n: (0, 0)),
                pl.BlockSpec((9 * Cout_p, Cin), lambda n: (0, 0)),
                pl.BlockSpec((Cout_p, 1), lambda n: (0, 0)),
            ],
            out_specs=pl.BlockSpec((nb, Cout_p, HW), lambda n: (n, 0, 0)),
        ),
        compiler_params=pltpu.CompilerParams(
            dimension_semantics=("parallel",),
            vmem_limit_bytes=vmem_limit),
    )(x_flat, gamma_col, beta_col, pmat, w_cat, bias_col)

    # Strip Cout padding (no-op when Cout is already a multiple of 8) + free reshape.
    return out_flat[:, :Cout, :].reshape(N, Cout, H, W)


def _reference(x_nchw, gamma, beta, w_oihw, bias):
    N, C, H, W = x_nchw.shape
    xg = x_nchw.reshape(N, GROUPS, C // GROUPS, H, W)
    mean = xg.mean(axis=(2, 3, 4), keepdims=True)
    var = xg.var(axis=(2, 3, 4), keepdims=True)
    xn = ((xg - mean) / jnp.sqrt(var + EPS)).reshape(N, C, H, W)
    xn = xn * gamma[None, :, None, None] + beta[None, :, None, None]
    xn = xn * jax.nn.sigmoid(xn)
    out = jax.lax.conv_general_dilated(
        xn, w_oihw, window_strides=(1, 1), padding="SAME",
        dimension_numbers=("NCHW", "OIHW", "NCHW"))
    return out + bias[None, :, None, None]


if __name__ == "__main__":
    N, Cin, Cout, H, W = 2, 64, 8, 16, 16
    key = jax.random.PRNGKey(0)
    kx, kg, kb, kw, kbias = jax.random.split(key, 5)

    x = jax.random.normal(kx, (N, Cin, H, W), dtype=jnp.float32)
    gamma = 1.0 + 0.1 * jax.random.normal(kg, (Cin,), dtype=jnp.float32)
    beta = 0.1 * jax.random.normal(kb, (Cin,), dtype=jnp.float32)
    w = 0.05 * jax.random.normal(kw, (Cout, Cin, 3, 3), dtype=jnp.float32)
    bias = 0.05 * jax.random.normal(kbias, (Cout,), dtype=jnp.float32)

    ref = _reference(x, gamma, beta, w, bias)

    # 1) exact path: f32 conv + f32 elementwise (tight tolerance).
    out_f32 = jax.block_until_ready(
        unet_output_layer(x, gamma, beta, w, bias,
                          conv_dtype=jnp.float32,
                          elementwise_dtype=jnp.float32))
    assert out_f32.shape == (N, Cout, H, W)
    assert jnp.allclose(out_f32, ref, atol=2e-4, rtol=2e-4), (
        float(jnp.max(jnp.abs(out_f32 - ref))))

    # 2) default fast path: bf16 conv matmul (+ bf16 elementwise on v6e/v7x).
    out_fast = jax.block_until_ready(unet_output_layer(x, gamma, beta, w, bias))
    assert jnp.allclose(out_fast, ref, atol=1e-1, rtol=1e-1), (
        float(jnp.max(jnp.abs(out_fast - ref))))

    # 3) fused-batch path: batch_block=2 -> one (9*Cout, Cin) @ (Cin, 2*H*W) conv
    #    matmul per grid step, still 2 parallel grid steps.
    x4 = jnp.concatenate([x, x + 0.25], axis=0)
    ref4 = _reference(x4, gamma, beta, w, bias)
    out4 = jax.block_until_ready(
        unet_output_layer(x4, gamma, beta, w, bias, batch_block=2))
    assert jnp.allclose(out4, ref4, atol=1e-1, rtol=1e-1), (
        float(jnp.max(jnp.abs(out4 - ref4))))

    print("KERNEL_OK")
</pallas_src>

<mosaic_0001>
module attributes {stable_mosaic.version = 11 : i64} {
  func.func @kernel(%arg0: i32, %arg1: memref<1x64x256xf32, #tpu.memory_space<vmem>>, %arg2: memref<64x1xf32, #tpu.memory_space<vmem>>, %arg3: memref<64x1xf32, #tpu.memory_space<vmem>>, %arg4: memref<64x64xf32, #tpu.memory_space<vmem>>, %arg5: memref<72x64xf32, #tpu.memory_space<vmem>>, %arg6: memref<8x1xf32, #tpu.memory_space<vmem>>, %arg7: memref<1x8x256xf32, #tpu.memory_space<vmem>>) attributes {dimension_semantics = [#tpu.dimension_semantics<parallel>], iteration_bounds = array<i64: 2>, scalar_prefetch = 0 : i64, scratch_operands = 0 : i64, tpu.core_type = #tpu.core_type<tc>, window_params = [{transform_indices = @transform_0, window_bounds = array<i64: 1, 64, 256>}, {pipeline_mode = #tpu.pipeline_mode<synchronous>, transform_indices = @transform_1, window_bounds = array<i64: 64, 1>}, {pipeline_mode = #tpu.pipeline_mode<synchronous>, transform_indices = @transform_2, window_bounds = array<i64: 64, 1>}, {pipeline_mode = #tpu.pipeline_mode<synchronous>, transform_indices = @transform_3, window_bounds = array<i64: 64, 64>}, {pipeline_mode = #tpu.pipeline_mode<synchronous>, transform_indices = @transform_4, window_bounds = array<i64: 72, 64>}, {pipeline_mode = #tpu.pipeline_mode<synchronous>, transform_indices = @transform_5, window_bounds = array<i64: 8, 1>}, {transform_indices = @transform_6, window_bounds = array<i64: 1, 8, 256>}]} {
    %c0 = arith.constant 0 : index
    %c0_0 = arith.constant 0 : index
    %0 = vector.load %arg2[%c0, %c0_0] : memref<64x1xf32, #tpu.memory_space<vmem>>, vector<64x1xf32>
    %c0_1 = arith.constant 0 : index
    %c0_2 = arith.constant 0 : index
    %1 = vector.load %arg3[%c0_1, %c0_2] : memref<64x1xf32, #tpu.memory_space<vmem>>, vector<64x1xf32>
    %c0_3 = arith.constant 0 : index
    %c0_4 = arith.constant 0 : index
    %2 = vector.load %arg4[%c0_3, %c0_4] : memref<64x64xf32, #tpu.memory_space<vmem>>, vector<64x64xf32>
    %c0_5 = arith.constant 0 : index
    %c0_6 = arith.constant 0 : index
    %3 = vector.load %arg5[%c0_5, %c0_6] : memref<72x64xf32, #tpu.memory_space<vmem>>, vector<72x64xf32>
    %c0_7 = arith.constant 0 : index
    %c0_8 = arith.constant 0 : index
    %4 = vector.load %arg6[%c0_7, %c0_8] : memref<8x1xf32, #tpu.memory_space<vmem>>, vector<8x1xf32>
    %5 = vector.shape_cast %4 : vector<8x1xf32> to vector<8x1xf32>
    %6 = vector.broadcast %5 : vector<8x1xf32> to vector<8x256xf32>
    %c0_9 = arith.constant 0 : index
    %c0_10 = arith.constant 0 : index
    %c0_11 = arith.constant 0 : index
    %7 = vector.load %arg1[%c0_9, %c0_10, %c0_11] : memref<1x64x256xf32, #tpu.memory_space<vmem>>, vector<1x64x256xf32>
    %8 = vector.shape_cast %7 : vector<1x64x256xf32> to vector<64x256xf32>
    %cst = arith.constant dense<0.000000e+00> : vector<64xf32>
    %9 = vector.multi_reduction <add>, %8, %cst [1] : vector<64x256xf32> to vector<64xf32>
    %10 = vector.shape_cast %9 : vector<64xf32> to vector<64x1xf32>
    %11 = arith.mulf %8, %8 : vector<64x256xf32>
    %cst_12 = arith.constant dense<0.000000e+00> : vector<64xf32>
    %12 = vector.multi_reduction <add>, %11, %cst_12 [1] : vector<64x256xf32> to vector<64xf32>
    %13 = vector.shape_cast %12 : vector<64xf32> to vector<64x1xf32>
    %14 = tpu.concatenate %10, %13 in 1 : vector<64x1xf32>, vector<64x1xf32> -> vector<64x2xf32>
    %cst_13 = arith.constant dense<0.000000e+00> : vector<64x2xf32>
    %15 = tpu.matmul %2, %14, %cst_13 {dimension_numbers = #tpu.dot_dimension_numbers<[1], [0], [0], [1], [0, 0, 1, 1], [], []>} : vector<64x64xf32>, vector<64x2xf32>, vector<64x2xf32> -> vector<64x2xf32>
    %16 = vector.extract_strided_slice %15 {offsets = [0, 0], sizes = [64, 1], strides = [1, 1]} : vector<64x2xf32> to vector<64x1xf32>
    %17 = vector.extract_strided_slice %15 {offsets = [0, 1], sizes = [64, 1], strides = [1, 1]} : vector<64x2xf32> to vector<64x1xf32>
    %18 = arith.mulf %16, %16 : vector<64x1xf32>
    %19 = arith.subf %17, %18 : vector<64x1xf32>
    %cst_14 = arith.constant 9.99999974E-6 : f32
    %20 = vector.broadcast %cst_14 : f32 to vector<64x1xf32>
    %21 = arith.addf %19, %20 : vector<64x1xf32>
    %22 = math.rsqrt %21 : vector<64x1xf32>
    %23 = arith.mulf %22, %0 : vector<64x1xf32>
    %24 = arith.mulf %16, %23 : vector<64x1xf32>
    %25 = arith.subf %1, %24 : vector<64x1xf32>
    %26 = vector.broadcast %23 : vector<64x1xf32> to vector<64x256xf32>
    %27 = arith.mulf %8, %26 : vector<64x256xf32>
    %28 = vector.broadcast %25 : vector<64x1xf32> to vector<64x256xf32>
    %29 = arith.addf %27, %28 : vector<64x256xf32>
    %30 = arith.negf %29 : vector<64x256xf32>
    %31 = math.exp %30 : vector<64x256xf32>
    %cst_15 = arith.constant 1.000000e+00 : f32
    %32 = vector.broadcast %cst_15 : f32 to vector<64x256xf32>
    %33 = arith.addf %32, %31 : vector<64x256xf32>
    %34 = arith.divf %32, %33 : vector<64x256xf32>
    %35 = arith.mulf %29, %34 : vector<64x256xf32>
    %cst_16 = arith.constant dense<0.000000e+00> : vector<72x256xf32>
    %36 = tpu.matmul %3, %35, %cst_16 {dimension_numbers = #tpu.dot_dimension_numbers<[1], [0], [0], [1], [0, 0, 1, 1], [], []>} : vector<72x64xf32>, vector<64x256xf32>, vector<72x256xf32> -> vector<72x256xf32>
    %37 = tpu.iota {dimensions = array<i32: 1>} : vector<1x256xi32>
    %c16_i32 = arith.constant 16 : i32
    %c0_i32 = arith.constant 0 : i32
    %38 = arith.cmpi eq, %c16_i32, %c0_i32 : i32
    %c1_i32 = arith.constant 1 : i32
    %39 = arith.select %38, %c1_i32, %c16_i32 : i32
    %40 = vector.broadcast %39 : i32 to vector<1x256xi32>
    %41 = arith.remsi %37, %40 : vector<1x256xi32>
    %c0_i32_17 = arith.constant 0 : i32
    %42 = vector.broadcast %c0_i32_17 : i32 to vector<1x256xi32>
    %43 = arith.cmpi ne, %41, %42 : vector<1x256xi32>
    %c0_i32_18 = arith.constant 0 : i32
    %44 = vector.broadcast %c0_i32_18 : i32 to vector<1x256xi32>
    %45 = arith.cmpi slt, %41, %44 : vector<1x256xi32>
    %c0_i32_19 = arith.constant 0 : i32
    %46 = arith.cmpi slt, %39, %c0_i32_19 : i32
    %47 = vector.broadcast %46 : i1 to vector<1x256xi1>
    %48 = vector.broadcast %47 : vector<1x256xi1> to vector<1x256xi1>
    %49 = arith.xori %45, %48 : vector<1x256xi1>
    %50 = arith.andi %49, %43 : vector<1x256xi1>
    %51 = vector.broadcast %39 : i32 to vector<1x256xi32>
    %52 = arith.addi %41, %51 : vector<1x256xi32>
    %53 = arith.select %50, %52, %41 : vector<1x256xi1>, vector<1x256xi32>
    %c1_i32_20 = arith.constant 1 : i32
    %54 = vector.broadcast %c1_i32_20 : i32 to vector<1x256xi32>
    %55 = arith.cmpi sge, %53, %54 : vector<1x256xi32>
    %c14_i32 = arith.constant 14 : i32
    %56 = vector.broadcast %c14_i32 : i32 to vector<1x256xi32>
    %57 = arith.cmpi sle, %53, %56 : vector<1x256xi32>
    %58 = vector.extract_strided_slice %36 {offsets = [32, 0], sizes = [8, 256], strides = [1, 1]} : vector<72x256xf32> to vector<8x256xf32>
    %59 = arith.addf %58, %6 : vector<8x256xf32>
    %60 = vector.extract_strided_slice %36 {offsets = [0, 0], sizes = [8, 256], strides = [1, 1]} : vector<72x256xf32> to vector<8x256xf32>
    %cst_21 = arith.constant 0.000000e+00 : f32
    %61 = vector.broadcast %cst_21 : f32 to vector<8x17xf32>
    %62 = vector.extract_strided_slice %60 {offsets = [0, 0], sizes = [8, 239], strides = [1, 1]} : vector<8x256xf32> to vector<8x239xf32>
    %63 = tpu.concatenate %61, %62 in 1 : vector<8x17xf32>, vector<8x239xf32> -> vector<8x256xf32>
    %cst_22 = arith.constant 0.000000e+00 : f32
    %64 = vector.shape_cast %55 : vector<1x256xi1> to vector<1x256xi1>
    %65 = vector.broadcast %64 : vector<1x256xi1> to vector<8x256xi1>
    %66 = vector.broadcast %cst_22 : f32 to vector<8x256xf32>
    %67 = arith.select %65, %63, %66 : vector<8x256xi1>, vector<8x256xf32>
    %68 = arith.addf %59, %67 : vector<8x256xf32>
    %69 = vector.extract_strided_slice %36 {offsets = [8, 0], sizes = [8, 256], strides = [1, 1]} : vector<72x256xf32> to vector<8x256xf32>
    %cst_23 = arith.constant 0.000000e+00 : f32
    %70 = vector.broadcast %cst_23 : f32 to vector<8x16xf32>
    %71 = vector.extract_strided_slice %69 {offsets = [0, 0], sizes = [8, 240], strides = [1, 1]} : vector<8x256xf32> to vector<8x240xf32>
    %72 = tpu.concatenate %70, %71 in 1 : vector<8x16xf32>, vector<8x240xf32> -> vector<8x256xf32>
    %73 = arith.addf %68, %72 : vector<8x256xf32>
    %74 = vector.extract_strided_slice %36 {offsets = [16, 0], sizes = [8, 256], strides = [1, 1]} : vector<72x256xf32> to vector<8x256xf32>
    %cst_24 = arith.constant 0.000000e+00 : f32
    %75 = vector.broadcast %cst_24 : f32 to vector<8x15xf32>
    %76 = vector.extract_strided_slice %74 {offsets = [0, 0], sizes = [8, 241], strides = [1, 1]} : vector<8x256xf32> to vector<8x241xf32>
    %77 = tpu.concatenate %75, %76 in 1 : vector<8x15xf32>, vector<8x241xf32> -> vector<8x256xf32>
    %cst_25 = arith.constant 0.000000e+00 : f32
    %78 = vector.shape_cast %57 : vector<1x256xi1> to vector<1x256xi1>
    %79 = vector.broadcast %78 : vector<1x256xi1> to vector<8x256xi1>
    %80 = vector.broadcast %cst_25 : f32 to vector<8x256xf32>
    %81 = arith.select %79, %77, %80 : vector<8x256xi1>, vector<8x256xf32>
    %82 = arith.addf %73, %81 : vector<8x256xf32>
    %83 = vector.extract_strided_slice %36 {offsets = [24, 0], sizes = [8, 256], strides = [1, 1]} : vector<72x256xf32> to vector<8x256xf32>
    %cst_26 = arith.constant 0.000000e+00 : f32
    %84 = vector.broadcast %cst_26 : f32 to vector<8x1xf32>
    %85 = vector.extract_strided_slice %83 {offsets = [0, 0], sizes = [8, 255], strides = [1, 1]} : vector<8x256xf32> to vector<8x255xf32>
    %86 = tpu.concatenate %84, %85 in 1 : vector<8x1xf32>, vector<8x255xf32> -> vector<8x256xf32>
    %cst_27 = arith.constant 0.000000e+00 : f32
    %87 = vector.shape_cast %55 : vector<1x256xi1> to vector<1x256xi1>
    %88 = vector.broadcast %87 : vector<1x256xi1> to vector<8x256xi1>
    %89 = vector.broadcast %cst_27 : f32 to vector<8x256xf32>
    %90 = arith.select %88, %86, %89 : vector<8x256xi1>, vector<8x256xf32>
    %91 = arith.addf %82, %90 : vector<8x256xf32>
    %92 = vector.extract_strided_slice %36 {offsets = [40, 0], sizes = [8, 256], strides = [1, 1]} : vector<72x256xf32> to vector<8x256xf32>
    %93 = vector.extract_strided_slice %92 {offsets = [0, 1], sizes = [8, 255], strides = [1, 1]} : vector<8x256xf32> to vector<8x255xf32>
    %cst_28 = arith.constant 0.000000e+00 : f32
    %94 = vector.broadcast %cst_28 : f32 to vector<8x1xf32>
    %95 = tpu.concatenate %93, %94 in 1 : vector<8x255xf32>, vector<8x1xf32> -> vector<8x256xf32>
    %cst_29 = arith.constant 0.000000e+00 : f32
    %96 = vector.shape_cast %57 : vector<1x256xi1> to vector<1x256xi1>
    %97 = vector.broadcast %96 : vector<1x256xi1> to vector<8x256xi1>
    %98 = vector.broadcast %cst_29 : f32 to vector<8x256xf32>
    %99 = arith.select %97, %95, %98 : vector<8x256xi1>, vector<8x256xf32>
    %100 = arith.addf %91, %99 : vector<8x256xf32>
    %101 = vector.extract_strided_slice %36 {offsets = [48, 0], sizes = [8, 256], strides = [1, 1]} : vector<72x256xf32> to vector<8x256xf32>
    %102 = vector.extract_strided_slice %101 {offsets = [0, 15], sizes = [8, 241], strides = [1, 1]} : vector<8x256xf32> to vector<8x241xf32>
    %cst_30 = arith.constant 0.000000e+00 : f32
    %103 = vector.broadcast %cst_30 : f32 to vector<8x15xf32>
    %104 = tpu.concatenate %102, %103 in 1 : vector<8x241xf32>, vector<8x15xf32> -> vector<8x256xf32>
    %cst_31 = arith.constant 0.000000e+00 : f32
    %105 = vector.shape_cast %55 : vector<1x256xi1> to vector<1x256xi1>
    %106 = vector.broadcast %105 : vector<1x256xi1> to vector<8x256xi1>
    %107 = vector.broadcast %cst_31 : f32 to vector<8x256xf32>
    %108 = arith.select %106, %104, %107 : vector<8x256xi1>, vector<8x256xf32>
    %109 = arith.addf %100, %108 : vector<8x256xf32>
    %110 = vector.extract_strided_slice %36 {offsets = [56, 0], sizes = [8, 256], strides = [1, 1]} : vector<72x256xf32> to vector<8x256xf32>
    %111 = vector.extract_strided_slice %110 {offsets = [0, 16], sizes = [8, 240], strides = [1, 1]} : vector<8x256xf32> to vector<8x240xf32>
    %cst_32 = arith.constant 0.000000e+00 : f32
    %112 = vector.broadcast %cst_32 : f32 to vector<8x16xf32>
    %113 = tpu.concatenate %111, %112 in 1 : vector<8x240xf32>, vector<8x16xf32> -> vector<8x256xf32>
    %114 = arith.addf %109, %113 : vector<8x256xf32>
    %115 = vector.extract_strided_slice %36 {offsets = [64, 0], sizes = [8, 256], strides = [1, 1]} : vector<72x256xf32> to vector<8x256xf32>
    %116 = vector.extract_strided_slice %115 {offsets = [0, 17], sizes = [8, 239], strides = [1, 1]} : vector<8x256xf32> to vector<8x239xf32>
    %cst_33 = arith.constant 0.000000e+00 : f32
    %117 = vector.broadcast %cst_33 : f32 to vector<8x17xf32>
    %118 = tpu.concatenate %116, %117 in 1 : vector<8x239xf32>, vector<8x17xf32> -> vector<8x256xf32>
    %cst_34 = arith.constant 0.000000e+00 : f32
    %119 = vector.shape_cast %57 : vector<1x256xi1> to vector<1x256xi1>
    %120 = vector.broadcast %119 : vector<1x256xi1> to vector<8x256xi1>
    %121 = vector.broadcast %cst_34 : f32 to vector<8x256xf32>
    %122 = arith.select %120, %118, %121 : vector<8x256xi1>, vector<8x256xf32>
    %123 = arith.addf %114, %122 : vector<8x256xf32>
    %c0_35 = arith.constant 0 : index
    %c0_36 = arith.constant 0 : index
    %c0_37 = arith.constant 0 : index
    %124 = vector.load %arg7[%c0_35, %c0_36, %c0_37] : memref<1x8x256xf32, #tpu.memory_space<vmem>>, vector<1x8x256xf32>
    %125 = vector.shape_cast %124 : vector<1x8x256xf32> to vector<8x256xf32>
    %126 = vector.shape_cast %123 : vector<8x256xf32> to vector<1x8x256xf32>
    tpu.vector_store %arg7[%c0_35, %c0_36, %c0_37], %126 {strides = array<i32>} : memref<1x8x256xf32, #tpu.memory_space<vmem>>, vector<1x8x256xf32>,
    return
  }
  func.func @transform_0(%arg0: i32) -> (i32, i32, i32) {
    %c0_i32 = arith.constant 0 : i32
    %c0_i32_0 = arith.constant 0 : i32
    %c0_i32_1 = arith.constant 0 : i32
    return %arg0, %c0_i32, %c0_i32_0 : i32, i32, i32
  }
  func.func @transform_1(%arg0: i32) -> (i32, i32) {
    %c0_i32 = arith.constant 0 : i32
    %c0_i32_0 = arith.constant 0 : i32
    %c0_i32_1 = arith.constant 0 : i32
    return %c0_i32, %c0_i32_0 : i32, i32
  }
  func.func @transform_2(%arg0: i32) -> (i32, i32) {
    %c0_i32 = arith.constant 0 : i32
    %c0_i32_0 = arith.constant 0 : i32
    %c0_i32_1 = arith.constant 0 : i32
    return %c0_i32, %c0_i32_0 : i32, i32
  }
  func.func @transform_3(%arg0: i32) -> (i32, i32) {
    %c0_i32 = arith.constant 0 : i32
    %c0_i32_0 = arith.constant 0 : i32
    %c0_i32_1 = arith.constant 0 : i32
    return %c0_i32, %c0_i32_0 : i32, i32
  }
  func.func @transform_4(%arg0: i32) -> (i32, i32) {
    %c0_i32 = arith.constant 0 : i32
    %c0_i32_0 = arith.constant 0 : i32
    %c0_i32_1 = arith.constant 0 : i32
    return %c0_i32, %c0_i32_0 : i32, i32
  }
  func.func @transform_5(%arg0: i32) -> (i32, i32) {
    %c0_i32 = arith.constant 0 : i32
    %c0_i32_0 = arith.constant 0 : i32
    %c0_i32_1 = arith.constant 0 : i32
    return %c0_i32, %c0_i32_0 : i32, i32
  }
  func.func @transform_6(%arg0: i32) -> (i32, i32, i32) {
    %c0_i32 = arith.constant 0 : i32
    %c0_i32_0 = arith.constant 0 : i32
    %c0_i32_1 = arith.constant 0 : i32
    return %arg0, %c0_i32, %c0_i32_0 : i32, i32, i32
  }
}

</mosaic_0001>

<bundles_post_ra>
// kernel: tpu_custom_call.1
= control target key start
LH: loop header
LB: loop body
LE: loop exit
PB: predicated region body
PF: predicated region fallthrough
CT: control target
= control target key end

     0   :  { %11 = vsyncpa [#allocation3], 0  ;;  %s2206_s0 = inlined_call_operand.vmem [shape: f32[2,64,256], index: 0, kind: input, shape index: {}]   ;;  %s2207_s1 = inlined_call_operand.vmem [shape: f32[64,1], index: 1, kind: input, shape index: {}]   ;;  %s2208_s2 = inlined_call_operand.vmem [shape: f32[64,1], index: 2, kind: input, shape index: {}]   ;;  %s2209_s3 = inlined_call_operand.hbm [shape: f32[64,64], index: 3, kind: input, shape index: {}]   ;;  %s2210_s4 = inlined_call_operand.vmem [shape: f32[72,64], index: 4, kind: input, shape index: {}]   ;;  %s2211_s5 = inlined_call_operand.vmem [shape: f32[8,1], index: 5, kind: input, shape index: {}]   ;;  %s2212_s6 = inlined_call_operand.hbm [shape: f32[2,8,256], index: 6, kind: output, shape index: {}]  }
   0x1   :  { %12 = vsyncpa [#allocation4], 0 }
   0x2   :  { %14 = vsyncpa [#allocation4 + $0x1], 0  ;;  %s1679_s21 = smov 0   ;;  %s1681_s22 = smov 0  }
   0x3   :  { %s1683_s23 = smov 0   ;;  %s1685_s24 = smov 0  }
   0x4 LB: > { %s1700_s25 = sadd.s32 4294967295, %s1627_s24   ;;  %s1281_s26 = sadd.s32 4294967294, %s1627_s24   ;;  %s1627_s24 = sphi %s1685_s24, %s2228_s24   ;;  %s1623_s23 = sphi %s1683_s23, %s2227_s23   ;;  %s1619_s22 = sphi %s1681_s22, %s2226_s22   ;;  %s1615_s21 = sphi %s1679_s21, %s2225_s21  }
   0x5   : > { %s1704_s27 = sadd.s32 1, %s1627_s24   ;;  %s158_s28 = sadd.s32 1, %s1623_s23 }
   0x6   : > { %s155_s29 = ssub.s32 %s1627_s24, %s1704_s27  ;;  %p168_p0 = scmp.ne.s32.totalorder %s1623_s23, %s1619_s22 }
   0x7   : > { %p156_p1 = scmp.eq.s32.totalorder %s155_s29, 0  ;;  %p169_p2 = scmp.eq.s32.totalorder %s1700_s25, 1 }
   0x8   : > { %p174_p3 = scmp.ne.s32.totalorder %s1619_s22, %s1615_s21  ;;  %p175_p4 = scmp.eq.s32.totalorder %s1281_s26, 1 }
   0x9   : > { %s1715_s30 = scalar_select %p156_p1, %s1623_s23, %s158_s28  }
   0xa   : > { %p1717_p5 = por %p169_p2, %p168_p0  ;;  %p1721_p6 = por %p175_p4, %p174_p3 }
   0xb   : > { %p1282_p7 = scmp.ge.s32.totalorder %s1627_s24, 1  ;;  %p182_p8 = scmp.lt.s32.totalorder %s1627_s24, 3 }
   0xc   : > { %s2214_s8 = scalar_select %p1721_p6, 1, 0 }
   0xd   : > { %p1404_p9 = scmp.eq.s32.totalorder %s1700_s25, 0  ;;  %p1728_p10 = pnand %p1282_p7, %p182_p8 }
   0xe   : > { %s1629_s10 = smov [#allocation2]  }
   0xf   : > { %s200_s11 = sshll.u32 %s1629_s10, 4  ;;  %p1396_p11 = pneg %p1728_p10  ;;  %s201_s11 = int_to_ptr.vmem [resolvable:$true] %s200_s11 }
  0x10   : > { %s1548_s12 = scalar_lea.vmem %s201_s11, 1024  ;;  %p1556_p3 = scmp.lt.s32.totalorder %s201_s11, %s201_s11 }
  0x11   : > { %p1397_p12 = pnand %p1404_p9, %p1396_p11  ;;  %p1549_p0 = scmp.ne.s32.totalorder %s201_s11, %s1548_s12 }
  0x12   : > { %p1557_p4 = scmp.lt.s32.totalorder %s1548_s12, %s1548_s12 }
  0x13   : > { %p1539_p13 = pneg %p1397_p12 }
  0x14   : > { %p1558_p6 = por %p1557_p4, %p1556_p3 }
  0x15   : > { %p1551_p1 = pnand %p1549_p0, %p1539_p13 }
  0x17   : > { %p1552_p2 = pneg %p1551_p1 }
  0x19   : > { %p1559_p7 = pnand %p1558_p6, %p1552_p2 }
  0x1b   : > { %1562 = shalt.err (!%p1559_p7)
}
  0x1c   : > { %s1630_s13 = smov 128   ;;  %s1631_s14 = smov 8  }
  0x1d   : > { %1399 = dma.hbm_to_vmem [thread:$0]  (!%p1397_p12), %s2209_s3, 1024, %s201_s11, [#allocation3], %s1630_s13, %s1630_s13, %s1631_s14  }
  0x1e   : > { %230 = sbr.rel (%p1728_p10) target bundleno = 1230 (0x4ce), region = 44 }
  0x23   : > { %1606 = dma.done.wait (%p1404_p9), [#allocation3], 1024  }
  0x24   : > { %1608 = vsyncadd (%p1404_p9), [#allocation3], 4294966272  ;;  %p260_p8 = scmp.lt.s32.totalorder %s1700_s25, 1  ;;  %v281_v48 = vld [vmem:[#allocation2] sm:$0xff]  ;;  %vm393_vm0 = vcmask 523264   ;;  %vm384_vm1 = vcmask 7168  }
  0x25   : > { %1362 = vmatprep.mubr.msk.f32.mxu0 %vm393_vm0, %v281_v48  ;;  %s1632_s28 = smov 1   ;;  %s1634_s10 = smov 127   ;;  %vm1076_vm2 = vcmask 138240   ;;  %vm1095_vm5 = vcmask 130048   ;;  %vm1108_vm6 = vcmask 121856   ;;  %vm1141_vm9 = vcmask 1039360  }
  0x26   : > { %s261_s17 = scalar_select %p260_p8, %s1700_s25, 1  ;;  %vm1156_vm10 = vcmask 924672   ;;  %vm1171_vm11 = vcmask 916480   ;;  %vm1184_vm12 = vcmask 908288  }
  0x27   : > { %s1638_s29 = smov 15   ;;  %s1639_s9 = smov 16  }
  0x28   : > { %s1328_s18 = sshll.u32 %s261_s17, 7  ;;  %s1640_s11 = smov 113  }
  0x29   : > { %s1750_s26 = scalar_lea.vmem %s2206_s0, %s1328_s18  ;;  %s1641_s12 = smov 112  }
  0x2a   : > { %v1753_v0 = vld [vmem:[%s1750_s26 + $0x70] sm:$0xff]  ;;  %v1756_v1 = vld [vmem:[%s1750_s26 + $0x78] sm:$0xff]  ;;  %v1759_v2 = vld [vmem:[%s1750_s26 + $0x60] sm:$0xff]  ;;  %s1642_s13 = smov 111   ;;  %s1329_s14 = sshll.u32 %s1700_s25, 8 }
  0x2b   : > { %v341_v3 = vadd.f32 %v1756_v1, %v1753_v0  ;;  %v1764_v4 = vld [vmem:[%s1750_s26 + $0x68] sm:$0xff]  ;;  %v356_v5 = vmul.f32 %v1759_v2, %v1759_v2  ;;  %v1769_v6 = vld [vmem:[%s1750_s26 + $0x50] sm:$0xff]  ;;  %v1772_v7 = vld [vmem:[%s1750_s26 + $0x58] sm:$0xff]  ;;  %v358_v17 = vmul.f32 %v1753_v0, %v1753_v0  ;;  %v359_v18 = vmul.f32 %v1756_v1, %v1756_v1  ;;  %s2169_s19 = scalar_lea.hbm %s2212_s6, %s1329_s14 }
  0x2c   : > { %v338_v8 = vadd.f32 %v1764_v4, %v1759_v2  ;;  %v357_v9 = vmul.f32 %v1764_v4, %v1764_v4  ;;  %v335_v10 = vadd.f32 %v1772_v7, %v1769_v6  ;;  %v354_v12 = vmul.f32 %v1769_v6, %v1769_v6  ;;  %v1785_v14 = vld [vmem:[%s1750_s26 + $0x40] sm:$0xff]  ;;  %v1788_v15 = vld [vmem:[%s1750_s26 + $0x48] sm:$0xff]  ;;  %v1801_v22 = vld [vmem:[%s1750_s26 + $0x30] sm:$0xff] }
  0x2d   : > { %342 = vadd.xlane.f32.xlu0 %v341_v3  ;;  %v355_v13 = vmul.f32 %v1772_v7, %v1772_v7  ;;  %v332_v16 = vadd.f32 %v1788_v15, %v1785_v14  ;;  %v352_v20 = vmul.f32 %v1785_v14, %v1785_v14  ;;  %v353_v21 = vmul.f32 %v1788_v15, %v1788_v15  ;;  %v1804_v23 = vld [vmem:[%s1750_s26 + $0x38] sm:$0xff]  ;;  %v1811_v28 = vld [vmem:[%s1750_s26 + $0x20] sm:$0xff]  ;;  %v1814_v29 = vld [vmem:[%s1750_s26 + $0x28] sm:$0xff] }
  0x2e   : > { %339 = vadd.xlane.f32.xlu1 %v338_v8  ;;  %v378_v11 = vadd.f32 %v357_v9, %v356_v5  ;;  %v381_v24 = vadd.f32 %v359_v18, %v358_v17  ;;  %v350_v26 = vmul.f32 %v1801_v22, %v1801_v22  ;;  %v351_v27 = vmul.f32 %v1804_v23, %v1804_v23  ;;  %v1823_v34 = vld [vmem:[%s1750_s26 + $0x10] sm:$0xff]  ;;  %v1826_v35 = vld [vmem:[%s1750_s26 + $0x18] sm:$0xff]  ;;  %v1835_v40 = vld [vmem:[%s1750_s26] sm:$0xff] }
  0x2f   : > { %v375_v19 = vadd.f32 %v355_v13, %v354_v12  ;;  %v372_v25 = vadd.f32 %v353_v21, %v352_v20  ;;  %v329_v30 = vadd.f32 %v1804_v23, %v1801_v22  ;;  %v348_v32 = vmul.f32 %v1811_v28, %v1811_v28  ;;  %v1838_v41 = vld [vmem:[%s1750_s26 + $0x8] sm:$0xff]  ;;  %v283_v18 = vld [vmem:[#allocation2 + $0x10] sm:$0xff]  ;;  %v285_v20 = vld [vmem:[#allocation2 + $0x20] sm:$0xff]  ;;  %s1637_s26 = smov 17  }
  0x30   : > { %v369_v31 = vadd.f32 %v351_v27, %v350_v26  ;;  %v349_v33 = vmul.f32 %v1814_v29, %v1814_v29  ;;  %v326_v36 = vadd.f32 %v1814_v29, %v1811_v28  ;;  %v346_v38 = vmul.f32 %v1823_v34, %v1823_v34  ;;  %v282_v17 = vld [vmem:[#allocation2 + $0x8] sm:$0xff] }
  0x31   : > { %336 = vadd.xlane.f32.xlu0 %v335_v10  ;;  %v347_v39 = vmul.f32 %v1826_v35, %v1826_v35  ;;  %v323_v42 = vadd.f32 %v1826_v35, %v1823_v34  ;;  %v344_v44 = vmul.f32 %v1835_v40, %v1835_v40  ;;  %v345_v45 = vmul.f32 %v1838_v41, %v1838_v41  ;;  %v286_v21 = vld [vmem:[#allocation2 + $0x28] sm:$0xff] }
  0x32   : > { %379 = vadd.xlane.f32.xlu1 %v378_v11  ;;  %v366_v37 = vadd.f32 %v349_v33, %v348_v32  ;;  %v320_v46 = vadd.f32 %v1838_v41, %v1835_v40 }
  0x33   : > { %v363_v43 = vadd.f32 %v347_v39, %v346_v38  ;;  %v360_v47 = vadd.f32 %v345_v45, %v344_v44 }
  0x35   : > { %333 = vadd.xlane.f32.xlu0 %v332_v16 }
  0x36   : > { %376 = vadd.xlane.f32.xlu1 %v375_v19  ;;  %v284_v19 = vld [vmem:[#allocation2 + $0x18] sm:$0xff] }
  0x39   : > { %382 = vadd.xlane.f32.xlu0 %v381_v24  ;;  %v287_v24 = vld [vmem:[#allocation2 + $0x30] sm:$0xff] }
  0x3a   : > { %373 = vadd.xlane.f32.xlu1 %v372_v25  ;;  %v288_v25 = vld [vmem:[#allocation2 + $0x38] sm:$0xff] }
  0x3d   : > { %330 = vadd.xlane.f32.xlu0 %v329_v30 }
  0x3e   : > { %370 = vadd.xlane.f32.xlu1 %v369_v31 }
  0x41   : > { %327 = vadd.xlane.f32.xlu0 %v326_v36 }
  0x42   : > { %367 = vadd.xlane.f32.xlu1 %v366_v37 }
  0x45   : > { %324 = vadd.xlane.f32.xlu0 %v323_v42 }
  0x46   : > { %364 = vadd.xlane.f32.xlu1 %v363_v43 }
  0x49   : > { %321 = vadd.xlane.f32.xlu0 %v320_v46 }
  0x4a   : > { %361 = vadd.xlane.f32.xlu1 %v360_v47  ;;  %v272_v47 = vld [vmem:[%s2207_s1 + $0x38] sm:$0xff] }
  0xb6   : > { %v343_v49 = vpop.xlane.xlu0 %342 }
  0xb7   : > { %v340_v50 = vpop.xlane.xlu1 %339 }
  0xba   : > { %v337_v51 = vpop.xlane.xlu0 %336 }
  0xbb   : > { %v380_v52 = vpop.xlane.xlu1 %379 }
  0xbc   : > { %v391_v58 = vsel %vm384_vm1, %v340_v50, %v380_v52  ;;  %v271_v50 = vld [vmem:[%s2207_s1 + $0x30] sm:$0xff]  ;;  %v269_v52 = vld [vmem:[%s2207_s1 + $0x20] sm:$0xff] }
  0xbe   : > { %v334_v53 = vpop.xlane.xlu0 %333 }
  0xbf   : > { %v377_v54 = vpop.xlane.xlu1 %376 }
  0xc0   : > { %v390_v61 = vsel %vm384_vm1, %v337_v51, %v377_v54  ;;  %v268_v51 = vld [vmem:[%s2207_s1 + $0x18] sm:$0xff]  ;;  %v1633_v54 = vmov 1  }
  0xc1   : > { %1453 = vset.pattern.permute.xlu0 %v1633_v54  ;;  %1454 = vset.pattern.permute.xlu1 %v1633_v54 }
  0xc2   : > { %v383_v55 = vpop.xlane.xlu0 %382 }
  0xc3   : > { %v374_v56 = vpop.xlane.xlu1 %373  ;;  %v392_v57 = vsel %vm384_vm1, %v343_v49, %v383_v55  ;;  %v270_v49 = vld [vmem:[%s2207_s1 + $0x28] sm:$0xff]  ;;  %v267_v55 = vld [vmem:[%s2207_s1 + $0x10] sm:$0xff] }
  0xc4   : > { %1346 = vmatprep.subr.mxu0 %v392_v57  ;;  %v389_v62 = vsel %vm384_vm1, %v334_v53, %v374_v56  ;;  %v266_v53 = vld [vmem:[%s2207_s1 + $0x8] sm:$0xff]  ;;  %v265_v56 = vld [vmem:[%s2207_s1] sm:$0xff] }
  0xc5   : > { %1347 = vmatpush3.msra.mxu0 %v392_v57 }
  0xc6   : > { %1348 = vmatprep.subr.mxu0 %v391_v58  ;;  %v331_v59 = vpop.xlane.xlu0 %330 }
  0xc7   : > { %v371_v60 = vpop.xlane.xlu1 %370  ;;  %1349 = vmatpush3.msra.mxu0 %v391_v58 }
  0xc8   : > { %1350 = vmatprep.subr.mxu0 %v390_v61  ;;  %v388_v5 = vsel %vm384_vm1, %v331_v59, %v371_v60 }
  0xc9   : > { %1351 = vmatpush3.msra.mxu0 %v390_v61 }
  0xca   : > { %1352 = vmatprep.subr.mxu0 %v389_v62  ;;  %v328_v63 = vpop.xlane.xlu0 %327 }
  0xcb   : > { %v368_v3 = vpop.xlane.xlu1 %367  ;;  %1353 = vmatpush3.msra.mxu0 %v389_v62 }
  0xcc   : > { %1354 = vmatprep.subr.mxu0 %v388_v5  ;;  %v387_v8 = vsel %vm384_vm1, %v328_v63, %v368_v3 }
  0xcd   : > { %1355 = vmatpush3.msra.mxu0 %v388_v5 }
  0xce   : > { %1356 = vmatprep.subr.mxu0 %v387_v8  ;;  %v325_v9 = vpop.xlane.xlu0 %324 }
  0xcf   : > { %v365_v10 = vpop.xlane.xlu1 %364  ;;  %1357 = vmatpush3.msra.mxu0 %v387_v8 }
  0xd0   : > { %v386_v11 = vsel %vm384_vm1, %v325_v9, %v365_v10 }
  0xd1   : > { %1358 = vmatprep.subr.mxu0 %v386_v11 }
  0xd2   : > { %1359 = vmatpush3.msra.mxu0 %v386_v11  ;;  %v322_v12 = vpop.xlane.xlu0 %321 }
  0xd3   : > { %v362_v13 = vpop.xlane.xlu1 %361 }
  0xd4   : > { %v385_v16 = vsel %vm384_vm1, %v322_v12, %v362_v13 }
  0xd5   : > { %1360 = vmatprep.subr.mxu0 %v385_v16 }
  0xd6   : > { %1361 = vmatpush3.msra.mxu0 %v385_v16 }
  0xd7   : > { %1363 = vmatmul.mubr.msk.f32.vlgmr.msra.gmra.mxu0 %vm393_vm0, %v282_v17 }
  0xd8   : > { %1365 = vmatprep.mubr.msk.f32.mxu0 %vm393_vm0, %v283_v18 }
  0xdb   : > { %1366 = vmatmul.mubr.msk.f32.gmra.mxu0 %vm393_vm0, %v284_v19 }
  0xdc   : > { %1368 = vmatprep.mubr.msk.f32.mxu0 %vm393_vm0, %v285_v20 }
  0xdf   : > { %1369 = vmatmul.mubr.msk.f32.gmra.mxu0 %vm393_vm0, %v286_v21 }
  0xe0   : > { %1371 = vmatprep.mubr.msk.f32.mxu0 %vm393_vm0, %v287_v24 }
  0xe3   : > { %1372 = vmatmul.mubr.msk.f32.gmra.mxu0 %vm393_vm0, %v288_v25 }
 0x197   : > { %v1864_v26 = vpop.f32.mrf.mxu0 }
 0x198   : > { %v524_v45 = vmul.f32 %v1864_v26, %v1864_v26 }
 0x199   : > { %v1866_v27 = vpop.f32.mrf.mxu0 }
 0x19a   : > { %v523_v48 = vmul.f32 %v1866_v27, %v1866_v27 }
 0x19b   : > { %v1868_v30 = vpop.f32.mrf.mxu0 }
 0x19c   : > { %v526_v43 = vmul.f32 %v1868_v30, %v1868_v30 }
 0x19d   : > { %v1870_v31 = vpop.f32.mrf.mxu0 }
 0x19e   : > { %v525_v46 = vmul.f32 %v1870_v31, %v1870_v31 }
 0x19f   : > { %v1872_v32 = vpop.f32.mrf.mxu0 }
 0x1a0   : > { %v528_v33 = vmul.f32 %v1872_v32, %v1872_v32 }
 0x1a1   : > { %v1876_v36 = vpop.f32.mrf.mxu0 }
 0x1a2   : > { %549 = vrot.lane.b32.xlu1 %v528_v33, %s1632_s28  ;;  %v527_v44 = vmul.f32 %v1876_v36, %v1876_v36 }
 0x1a3   : > { %v1879_v37 = vpop.f32.mrf.mxu0 }
 0x1a4   : > { %v530_v38 = vmul.f32 %v1879_v37, %v1879_v37 }
 0x1a5   : > { %v1883_v39 = vpop.f32.mrf.mxu0 }
 0x1a6   : > { %v529_v42 = vmul.f32 %v1883_v39, %v1883_v39  ;;  %553 = vrot.lane.b32.xlu0 %v530_v38, %s1632_s28 }
 0x1a8   : > { %551 = vrot.lane.b32.xlu1 %v529_v42, %s1632_s28 }
 0x1aa   : > { %545 = vrot.lane.b32.xlu0 %v526_v43, %s1632_s28 }
 0x1ac   : > { %547 = vrot.lane.b32.xlu1 %v527_v44, %s1632_s28 }
 0x1ae   : > { %541 = vrot.lane.b32.xlu0 %v524_v45, %s1632_s28 }
 0x1b0   : > { %543 = vrot.lane.b32.xlu1 %v525_v46, %s1632_s28 }
 0x1b2   : > { %609 = vrot.lane.b32.xlu0 %v272_v47, %s1632_s28 }
 0x1b4   : > { %539 = vrot.lane.b32.xlu1 %v523_v48, %s1632_s28 }
 0x1b6   : > { %605 = vrot.lane.b32.xlu0 %v270_v49, %s1632_s28 }
 0x1b8   : > { %607 = vrot.lane.b32.xlu1 %v271_v50, %s1632_s28 }
 0x1ba   : > { %601 = vrot.lane.b32.xlu0 %v268_v51, %s1632_s28 }
 0x1bc   : > { %603 = vrot.lane.b32.xlu1 %v269_v52, %s1632_s28 }
 0x1be   : > { %597 = vrot.lane.b32.xlu0 %v266_v53, %s1632_s28 }
 0x1c0   : > { %599 = vrot.lane.b32.xlu1 %v267_v55, %s1632_s28 }
 0x1c4   : > { %595 = vrot.lane.b32.xlu1 %v265_v56, %s1632_s28 }
 0x214   : > { %v550_v57 = vpop.permute.xlu1 %549 }
 0x215   : > { %v568_v59 = vsub.f32 %v1872_v32, %v550_v57 }
 0x217   : > { %v576_v5 = vadd.f32 1e-05, %v568_v59 }
 0x218   : > { %v554_v58 = vpop.permute.xlu0 %553 }
 0x219   : > { %v570_v60 = vsub.f32 %v1879_v37, %v554_v58 }
 0x21a   : > { %v552_v61 = vpop.permute.xlu1 %551 }
 0x21b   : > { %v578_v62 = vadd.f32 1e-05, %v570_v60  ;;  %v569_v63 = vsub.f32 %v1883_v39, %v552_v61 }
 0x21c   : > { %v546_v3 = vpop.permute.xlu0 %545 }
 0x21d   : > { %1457 = vrsqrt.f32 %v578_v62  ;;  %v577_v8 = vadd.f32 1e-05, %v569_v63  ;;  %v566_v9 = vsub.f32 %v1868_v30, %v546_v3 }
 0x21e   : > { %v548_v10 = vpop.permute.xlu1 %547 }
 0x21f   : > { %1459 = vrsqrt.f32 %v577_v8  ;;  %v574_v11 = vadd.f32 1e-05, %v566_v9  ;;  %v567_v12 = vsub.f32 %v1876_v36, %v548_v10  ;;  %v278_v10 = vld [vmem:[%s2208_s2 + $0x28] sm:$0xff] }
 0x220   : > { %v542_v13 = vpop.permute.xlu0 %541  ;;  %1461 = vrsqrt.f32 %v576_v5  ;;  %v1635_v5 = vmov 0  }
 0x221   : > { %v575_v16 = vadd.f32 1e-05, %v567_v12  ;;  %v564_v17 = vsub.f32 %v1864_v26, %v542_v13  ;;  %1463 = vrsqrt.f32 %v574_v11 }
 0x222   : > { %v544_v18 = vpop.permute.xlu1 %543 }
 0x223   : > { %1465 = vrsqrt.f32 %v575_v16  ;;  %v572_v19 = vadd.f32 1e-05, %v564_v17  ;;  %v565_v20 = vsub.f32 %v1870_v31, %v544_v18  ;;  %v277_v18 = vld [vmem:[%s2208_s2 + $0x20] sm:$0xff] }
 0x224   : > { %v610_v21 = vpop.permute.xlu0 %609 }
 0x225   : > { %v573_v24 = vadd.f32 1e-05, %v565_v20  ;;  %1467 = vrsqrt.f32 %v572_v19 }
 0x226   : > { %v540_v25 = vpop.permute.xlu1 %539 }
 0x227   : > { %1469 = vrsqrt.f32 %v573_v24  ;;  %v563_v33 = vsub.f32 %v1866_v27, %v540_v25  ;;  %v280_v24 = vld [vmem:[%s2208_s2 + $0x38] sm:$0xff] }
 0x228   : > { %v606_v43 = vpop.permute.xlu0 %605 }
 0x229   : > { %v571_v38 = vadd.f32 1e-05, %v563_v33 }
 0x22a   : > { %v1458_v42 = vpop.eup %1457  ;;  %v608_v44 = vpop.permute.xlu1 %607 }
 0x22b   : > { %v626_v45 = vmul.f32 %v1458_v42, %v610_v21  ;;  %1471 = vrsqrt.f32 %v571_v38 }
 0x22c   : > { %v1460_v46 = vpop.eup %1459  ;;  %v602_v49 = vpop.permute.xlu0 %601 }
 0x22d   : > { %v625_v47 = vmul.f32 %v1460_v46, %v608_v44  ;;  %649 = vrot.lane.b32.xlu0 %v626_v45, %s1634_s10  ;;  %v1462_v48 = vpop.eup %1461  ;;  %v276_v46 = vld [vmem:[%s2208_s2 + $0x18] sm:$0xff] }
 0x22e   : > { %v604_v50 = vpop.permute.xlu1 %603  ;;  %v1464_v51 = vpop.eup %1463  ;;  %v624_v52 = vmul.f32 %v1462_v48, %v606_v43 }
 0x22f   : > { %647 = vrot.lane.b32.xlu1 %v625_v47, %s1634_s10  ;;  %v622_v57 = vmul.f32 %v1464_v51, %v602_v49 }
 0x230   : > { %v1466_v53 = vpop.eup %1465  ;;  %v598_v59 = vpop.permute.xlu0 %597 }
 0x231   : > { %v623_v54 = vmul.f32 %v1466_v53, %v604_v50  ;;  %645 = vrot.lane.b32.xlu0 %v624_v52, %s1634_s10 }
 0x232   : > { %v600_v55 = vpop.permute.xlu1 %599  ;;  %v1468_v56 = vpop.eup %1467 }
 0x233   : > { %643 = vrot.lane.b32.xlu1 %v623_v54, %s1634_s10  ;;  %v620_v62 = vmul.f32 %v1468_v56, %v598_v59 }
 0x234   : > { %v1470_v58 = vpop.eup %1469 }
 0x235   : > { %v621_v60 = vmul.f32 %v1470_v58, %v600_v55  ;;  %641 = vrot.lane.b32.xlu0 %v622_v57, %s1634_s10 }
 0x236   : > { %v596_v61 = vpop.permute.xlu1 %595 }
 0x237   : > { %639 = vrot.lane.b32.xlu1 %v621_v60, %s1634_s10 }
 0x238   : > { %v1472_v63 = vpop.eup %1471 }
 0x239   : > { %v619_v3 = vmul.f32 %v1472_v63, %v596_v61  ;;  %637 = vrot.lane.b32.xlu0 %v620_v62, %s1634_s10 }
 0x23b   : > { %635 = vrot.lane.b32.xlu1 %v619_v3, %s1634_s10 }
 0x23d   : > { %704 = vperm.xlu0 %1453, %v626_v45  }
 0x23f   : > { %700 = vperm.xlu1 %1454, %v625_v47  }
 0x241   : > { %696 = vperm.xlu0 %1453, %v624_v52   ;;  %v1636_v52 = vmov 0.0  }
 0x242   : > { %982 = vmatprep.mubr.f32.mxu0 %v1636_v52  ;;  %994 = vmatprep.mubr.f32.mxu1 %v1636_v52 }
 0x243   : > { %1455 = vset.pattern.permute.xlu1 %v1635_v5 }
 0x245   : > { %692 = vperm.xlu0 %1453, %v623_v54  }
 0x249   : > { %688 = vperm.xlu0 %1453, %v622_v57  }
 0x24d   : > { %684 = vperm.xlu0 %1453, %v621_v60  }
 0x251   : > { %680 = vperm.xlu0 %1453, %v620_v62  }
 0x255   : > { %676 = vperm.xlu0 %1453, %v619_v3  }
 0x259   : > { %1456 = vset.pattern.permute.xlu0 %v1635_v5 }
 0x29f   : > { %v650_v8 = vpop.permute.xlu0 %649 }
 0x2a0   : > { %v666_v20 = vmul.f32 %v1879_v37, %v650_v8  ;;  %v279_v37 = vld [vmem:[%s2208_s2 + $0x30] sm:$0xff] }
 0x2a1   : > { %v648_v9 = vpop.permute.xlu1 %647 }
 0x2a2   : > { %v665_v33 = vmul.f32 %v648_v9, %v1883_v39 }
 0x2a3   : > { %v646_v11 = vpop.permute.xlu0 %645 }
 0x2a4   : > { %v664_v12 = vmul.f32 %v1872_v32, %v646_v11  ;;  %v273_v32 = vld [vmem:[%s2208_s2] sm:$0xff]  ;;  %v673_v44 = vsub.f32 %v279_v37, %v665_v33 }
 0x2a5   : > { %v644_v13 = vpop.permute.xlu1 %643 }
 0x2a6   : > { %v672_v16 = vsub.f32 %v278_v10, %v664_v12  ;;  %v663_v17 = vmul.f32 %v644_v13, %v1876_v36  ;;  %v674_v36 = vsub.f32 %v280_v24, %v666_v20 }
 0x2a7   : > { %v642_v42 = vpop.permute.xlu0 %641 }
 0x2a8   : > { %750 = vperm.xlu1 %1455, %v672_v16   ;;  %v671_v21 = vsub.f32 %v277_v18, %v663_v17  ;;  %v662_v45 = vmul.f32 %v1868_v30, %v642_v42  ;;  %v274_v30 = vld [vmem:[%s2208_s2 + $0x8] sm:$0xff] }
 0x2a9   : > { %v640_v19 = vpop.permute.xlu1 %639 }
 0x2aa   : > { %v670_v47 = vsub.f32 %v276_v46, %v662_v45  ;;  %v661_v39 = vmul.f32 %v640_v19, %v1870_v31  ;;  %v298_v31 = vld [vmem:[%s2211_s5] sm:$0xff] }
 0x2ab   : > { %v638_v48 = vpop.permute.xlu0 %637 }
 0x2ac   : > { %745 = vperm.xlu1 %1455, %v671_v21   ;;  %v660_v50 = vmul.f32 %v1864_v26, %v638_v48 }
 0x2ad   : > { %v636_v25 = vpop.permute.xlu1 %635 }
 0x2ae   : > { %v659_v38 = vmul.f32 %v636_v25, %v1866_v27  ;;  %v275_v27 = vld [vmem:[%s2208_s2 + $0x10] sm:$0xff]  ;;  %v668_v51 = vsub.f32 %v274_v30, %v660_v50 }
 0x2af   : > { %v669_v49 = vsub.f32 %v275_v27, %v661_v39 }
 0x2b0   : > { %v667_v43 = vsub.f32 %v273_v32, %v659_v38  ;;  %760 = vperm.xlu1 %1455, %v674_v36  }
 0x2b2   : > { %725 = vperm.xlu0 %1456, %v667_v43  }
 0x2b4   : > { %755 = vperm.xlu1 %1455, %v673_v44  }
 0x2b8   : > { %740 = vperm.xlu1 %1455, %v670_v47   ;;  %v705_v53 = vpop.permute.xlu0 %704 }
 0x2ba   : > { %v701_v57 = vpop.permute.xlu1 %700 }
 0x2bb   : > { %v719_v19 = vmul.f32 %v701_v57, %v1759_v2  ;;  %v720_v20 = vmul.f32 %v701_v57, %v1764_v4 }
 0x2bc   : > { %735 = vperm.xlu1 %1455, %v669_v49   ;;  %v697_v54 = vpop.permute.xlu0 %696 }
 0x2bd   : > { %v717_v58 = vmul.f32 %v697_v54, %v1769_v6  ;;  %v718_v60 = vmul.f32 %v697_v54, %v1772_v7  ;;  %v721_v6 = vmul.f32 %v705_v53, %v1753_v0  ;;  %v722_v7 = vmul.f32 %v705_v53, %v1756_v1 }
 0x2c0   : > { %730 = vperm.xlu1 %1455, %v668_v51   ;;  %v693_v26 = vpop.permute.xlu0 %692 }
 0x2c1   : > { %v716_v63 = vmul.f32 %v693_v26, %v1788_v15  ;;  %v715_v10 = vmul.f32 %v693_v26, %v1785_v14 }
 0x2c4   : > { %301 = vperm.xlu1 %1455, %v298_v31   ;;  %v689_v55 = vpop.permute.xlu0 %688 }
 0x2c5   : > { %v713_v33 = vmul.f32 %v689_v55, %v1801_v22  ;;  %v714_v38 = vmul.f32 %v689_v55, %v1804_v23 }
 0x2c8   : > { %v685_v56 = vpop.permute.xlu0 %684 }
 0x2c9   : > { %v711_v23 = vmul.f32 %v685_v56, %v1811_v28 }
 0x2cc   : > { %v1991_v61 = vpop.permute.xlu0 %680 }
 0x2cd   : > { %v709_v54 = vmul.f32 %v1991_v61, %v1823_v34  ;;  %v710_v55 = vmul.f32 %v1991_v61, %v1826_v35 }
 0x2d0   : > { %v677_v11 = vpop.permute.xlu0 %676 }
 0x2d1   : > { %v707_v21 = vmul.f32 %v677_v11, %v1835_v40  ;;  %v708_v4 = vmul.f32 %v677_v11, %v1838_v41  ;;  %v712_v41 = vmul.f32 %v685_v56, %v1814_v29 }
 0x323   : > { %v751_v59 = vpop.permute.xlu1 %750 }
 0x324   : > { %v1993_v62 = vadd.f32 %v751_v59, %v717_v58  ;;  %v1996_v3 = vadd.f32 %v751_v59, %v718_v60 }
 0x326   : > { %v1308_v5 = vmul.f32 -1.442695, %v1993_v62  ;;  %v1309_v12 = vmul.f32 -1.442695, %v1996_v3 }
 0x327   : > { %v746_v8 = vpop.permute.xlu1 %745 }
 0x328   : > { %v1999_v9 = vadd.f32 %v746_v8, %v716_v63  ;;  %1473 = vpow2.f32 %v1308_v5  ;;  %v2005_v13 = vadd.f32 %v746_v8, %v715_v10 }
 0x329   : > { %1475 = vpow2.f32 %v1309_v12 }
 0x32a   : > { %v1307_v15 = vmul.f32 -1.442695, %v1999_v9  ;;  %v1306_v24 = vmul.f32 -1.442695, %v2005_v13 }
 0x32b   : > { %v761_v16 = vpop.permute.xlu1 %760 }
 0x32c   : > { %v2008_v17 = vadd.f32 %v761_v16, %v721_v6  ;;  %v2010_v18 = vadd.f32 %v761_v16, %v722_v7  ;;  %1477 = vpow2.f32 %v1307_v15 }
 0x32d   : > { %v726_v1 = vpop.permute.xlu0 %725 }
 0x32e   : > { %v1312_v14 = vmul.f32 -1.442695, %v2008_v17  ;;  %v1313_v0 = vmul.f32 -1.442695, %v2010_v18  ;;  %v2020_v36 = vadd.f32 %v726_v1, %v707_v21  ;;  %v2029_v43 = vadd.f32 %v726_v1, %v708_v4 }
 0x32f   : > { %v756_v32 = vpop.permute.xlu1 %755 }
 0x330   : > { %1479 = vpow2.f32 %v1312_v14  ;;  %v2018_v25 = vadd.f32 %v756_v32, %v719_v19  ;;  %v2022_v2 = vadd.f32 %v756_v32, %v720_v20  ;;  %v1298_v46 = vmul.f32 -1.442695, %v2020_v36 }
 0x331   : > { %1481 = vpow2.f32 %v1313_v0  ;;  %v1299_v48 = vmul.f32 -1.442695, %v2029_v43 }
 0x332   : > { %v1310_v40 = vmul.f32 -1.442695, %v2018_v25  ;;  %1483 = vpow2.f32 %v1306_v24  ;;  %v1311_v37 = vmul.f32 -1.442695, %v2022_v2 }
 0x333   : > { %v741_v42 = vpop.permute.xlu1 %740 }
 0x334   : > { %1485 = vpow2.f32 %v1310_v40  ;;  %v2031_v44 = vadd.f32 %v741_v42, %v713_v33  ;;  %v2033_v45 = vadd.f32 %v741_v42, %v714_v38 }
 0x335   : > { %1487 = vpow2.f32 %v1311_v37  ;;  %v1474_v22 = vpop.eup %1473 }
 0x336   : > { %v1304_v47 = vmul.f32 -1.442695, %v2031_v44  ;;  %v1305_v39 = vmul.f32 -1.442695, %v2033_v45  ;;  %v837_v30 = vadd.f32 1.0, %v1474_v22  ;;  %1489 = vpow2.f32 %v1298_v46  ;;  %v1476_v31 = vpop.eup %1475 }
 0x337   : > { %v736_v27 = vpop.permute.xlu1 %735  ;;  %v838_v57 = vadd.f32 1.0, %v1476_v31 }
 0x338   : > { %v2041_v49 = vadd.f32 %v736_v27, %v711_v23  ;;  %v2043_v50 = vadd.f32 %v736_v27, %v712_v41  ;;  %1491 = vpow2.f32 %v1304_v47 }
 0x339   : > { %1493 = vpow2.f32 %v1305_v39  ;;  %v1478_v53 = vpop.eup %1477 }
 0x33a   : > { %v1302_v51 = vmul.f32 -1.442695, %v2041_v49  ;;  %v1303_v28 = vmul.f32 -1.442695, %v2043_v50  ;;  %1495 = vpow2.f32 %v1299_v48  ;;  %v836_v60 = vadd.f32 1.0, %v1478_v53 }
 0x33b   : > { %v731_v29 = vpop.permute.xlu1 %730  ;;  %1497 = vrcp.f32 %v837_v30 }
 0x33c   : > { %1499 = vpow2.f32 %v1302_v51  ;;  %v2051_v59 = vadd.f32 %v731_v29, %v709_v54  ;;  %v2053_v5 = vadd.f32 %v731_v29, %v710_v55 }
 0x33d   : > { %v1480_v26 = vpop.eup %1479  ;;  %1501 = vpow2.f32 %v1303_v28 }
 0x33e   : > { %v1482_v56 = vpop.eup %1481  ;;  %v841_v58 = vadd.f32 1.0, %v1480_v26  ;;  %v1300_v35 = vmul.f32 -1.442695, %v2051_v59  ;;  %v1301_v7 = vmul.f32 -1.442695, %v2053_v5 }
 0x33f   : > { %v842_v63 = vadd.f32 1.0, %v1482_v56  ;;  %v1484_v8 = vpop.eup %1483 }
 0x340   : > { %1503 = vrcp.f32 %v841_v58  ;;  %v835_v11 = vadd.f32 1.0, %v1484_v8  ;;  %v296_v8 = vld [vmem:[%s2210_s4 + $0x38] sm:$0xff] }
 0x341   : > { %v1486_v34 = vpop.eup %1485  ;;  %1505 = vrcp.f32 %v842_v63  ;;  %v294_v63 = vld [vmem:[%s2210_s4 + $0x28] sm:$0xff] }
 0x342   : > { %v1488_v10 = vpop.eup %1487  ;;  %1507 = vrcp.f32 %v838_v57  ;;  %v839_v6 = vadd.f32 1.0, %v1486_v34  ;;  %v297_v34 = vld [vmem:[%s2210_s4 + $0x40] sm:$0xff] }
 0x343   : > { %1509 = vrcp.f32 %v836_v60  ;;  %v840_v61 = vadd.f32 1.0, %v1488_v10  ;;  %v1490_v12 = vpop.eup %1489  ;;  %v291_v60 = vld [vmem:[%s2210_s4 + $0x10] sm:$0xff] }
 0x344   : > { %1511 = vrcp.f32 %v839_v6 }
 0x345   : > { %1513 = vrcp.f32 %v840_v61  ;;  %v1492_v15 = vpop.eup %1491 }
 0x346   : > { %1515 = vpow2.f32 %v1300_v35  ;;  %v1494_v16 = vpop.eup %1493  ;;  %v833_v19 = vadd.f32 1.0, %v1492_v15 }
 0x347   : > { %1517 = vpow2.f32 %v1301_v7  ;;  %v1496_v14 = vpop.eup %1495  ;;  %v834_v0 = vadd.f32 1.0, %v1494_v16 }
 0x348   : > { %1519 = vrcp.f32 %v835_v11  ;;  %v1498_v1 = vpop.eup %1497  ;;  %v828_v22 = vadd.f32 1.0, %v1496_v14 }
 0x349   : > { %1521 = vrcp.f32 %v833_v19  ;;  %v1500_v20 = vpop.eup %1499  ;;  %v885_v31 = vmul.f32 %v1498_v1, %v1993_v62 }
 0x34a   : > { %1523 = vrcp.f32 %v834_v0  ;;  %v1502_v21 = vpop.eup %1501  ;;  %v831_v24 = vadd.f32 1.0, %v1500_v20 }
 0x34b   : > { %v832_v33 = vadd.f32 1.0, %v1502_v21 }
 0x34c   : > { %1525 = vrcp.f32 %v831_v24 }
 0x34d   : > { %v1504_v32 = vpop.eup %1503  ;;  %1527 = vrcp.f32 %v832_v33  ;;  %v1037_v33 = vlaneseq }
 0x34e   : > { %v1506_v38 = vpop.eup %1505  ;;  %v889_v4 = vmul.f32 %v1504_v32, %v2008_v17  ;;  %v827_v17 = vadd.f32 1.0, %v1490_v12  ;;  %1529 = vrcp.f32 %v828_v22 }
 0x34f   : > { %v1508_v40 = vpop.eup %1507  ;;  %v890_v37 = vmul.f32 %v1506_v38, %v2010_v18  ;;  %v1038_v38 = vand.u32 127, %v1037_v33 }
 0x350   : > { %v1510_v42 = vpop.eup %1509  ;;  %v886_v18 = vmul.f32 %v1508_v40, %v1996_v3 }
 0x351   : > { %v1512_v46 = vpop.eup %1511  ;;  %934 = vmatprep.subr.mxu0 %v890_v37  ;;  %1374 = vmatprep.subr.mxu1 %v890_v37  ;;  %v884_v28 = vmul.f32 %v1510_v42, %v1999_v9  ;;  %v1039_v40 = vadd.s32 128, %v1038_v38 }
 0x352   : > { %v1514_v23 = vpop.eup %1513  ;;  %v887_v41 = vmul.f32 %v1512_v46, %v2018_v25  ;;  %935 = vmatpush1.msra.mxu0 %v889_v4  ;;  %1382 = vmatpush1.msra.mxu1 %v889_v4  ;;  %v302_v4 = vpop.permute.xlu1 %301  ;;  %v1044_v46 = vand.u32 15, %v1038_v38 }
 0x353   : > { %v1516_v47 = vpop.eup %1515  ;;  %v888_v39 = vmul.f32 %v1514_v23, %v2022_v2  ;;  %v1051_v22 = vand.u32 15, %v1039_v40 }
 0x354   : > { %v1518_v27 = vpop.eup %1517  ;;  %v829_v48 = vadd.f32 1.0, %v1516_v47  ;;  %vm2120_vm3 = vcmp.ge.s32.totalorder %v1044_v46, 1  ;;  %vm2132_vm7 = vcmp.le.s32.totalorder %v1044_v46, 14 }
 0x355   : > { %v1520_v30 = vpop.eup %1519  ;;  %v830_v51 = vadd.f32 1.0, %v1518_v27  ;;  %936 = vmatprep.subr.mxu0 %v888_v39  ;;  %1375 = vmatprep.subr.mxu1 %v888_v39  ;;  %vm2124_vm4 = vcmp.ge.s32.totalorder %v1051_v22, 1  ;;  %vm2136_vm8 = vcmp.le.s32.totalorder %v1051_v22, 14 }
 0x356   : > { %1531 = vrcp.f32 %v829_v48  ;;  %937 = vmatpush1.msra.mxu0 %v887_v41  ;;  %1383 = vmatpush1.msra.mxu1 %v887_v41  ;;  %v1522_v25 = vpop.eup %1521  ;;  %v883_v29 = vmul.f32 %v1520_v30, %v2005_v13 }
 0x357   : > { %1533 = vrcp.f32 %v830_v51  ;;  %938 = vmatprep.subr.mxu0 %v886_v18  ;;  %1376 = vmatprep.subr.mxu1 %v886_v18  ;;  %v1524_v2 = vpop.eup %1523  ;;  %v881_v62 = vmul.f32 %v1522_v25, %v2031_v44 }
 0x358   : > { %1535 = vrcp.f32 %v827_v17  ;;  %939 = vmatpush1.msra.mxu0 %v885_v31  ;;  %1384 = vmatpush1.msra.mxu1 %v885_v31  ;;  %v882_v3 = vmul.f32 %v1524_v2, %v2033_v45 }
 0x359   : > { %940 = vmatprep.subr.mxu0 %v884_v28  ;;  %1377 = vmatprep.subr.mxu1 %v884_v28  ;;  %v1526_v53 = vpop.eup %1525 }
 0x35a   : > { %941 = vmatpush1.msra.mxu0 %v883_v29  ;;  %1385 = vmatpush1.msra.mxu1 %v883_v29  ;;  %v1528_v9 = vpop.eup %1527  ;;  %v879_v54 = vmul.f32 %v1526_v53, %v2041_v49 }
 0x35b   : > { %942 = vmatprep.subr.mxu0 %v882_v3  ;;  %1378 = vmatprep.subr.mxu1 %v882_v3  ;;  %v880_v13 = vmul.f32 %v1528_v9, %v2043_v50  ;;  %v1530_v45 = vpop.eup %1529  ;;  %v289_v50 = vld [vmem:[%s2210_s4] sm:$0xff] }
 0x35c   : > { %943 = vmatpush1.msra.mxu0 %v881_v62  ;;  %1386 = vmatpush1.msra.mxu1 %v881_v62  ;;  %v876_v58 = vmul.f32 %v1530_v45, %v2029_v43  ;;  %v290_v43 = vld [vmem:[%s2210_s4 + $0x8] sm:$0xff] }
 0x35d   : > { %944 = vmatprep.subr.mxu0 %v880_v13  ;;  %1379 = vmatprep.subr.mxu1 %v880_v13 }
 0x35e   : > { %945 = vmatpush1.msra.mxu0 %v879_v54  ;;  %1387 = vmatpush1.msra.mxu1 %v879_v54 }
 0x363   : > { %v1532_v26 = vpop.eup %1531 }
 0x364   : > { %v1534_v55 = vpop.eup %1533  ;;  %v877_v44 = vmul.f32 %v1532_v26, %v2051_v59  ;;  %v293_v59 = vld [vmem:[%s2210_s4 + $0x20] sm:$0xff] }
 0x365   : > { %v1536_v56 = vpop.eup %1535  ;;  %v878_v57 = vmul.f32 %v1534_v55, %v2053_v5  ;;  %v295_v5 = vld [vmem:[%s2210_s4 + $0x30] sm:$0xff] }
 0x366   : > { %v875_v49 = vmul.f32 %v1536_v56, %v2020_v36  ;;  %v292_v36 = vld [vmem:[%s2210_s4 + $0x18] sm:$0xff] }
 0x367   : > { %946 = vmatprep.subr.mxu0 %v878_v57  ;;  %1380 = vmatprep.subr.mxu1 %v878_v57 }
 0x368   : > { %947 = vmatpush1.msra.mxu0 %v877_v44  ;;  %1388 = vmatpush1.msra.mxu1 %v877_v44 }
 0x369   : > { %948 = vmatprep.subr.mxu0 %v876_v58  ;;  %1381 = vmatprep.subr.mxu1 %v876_v58 }
 0x36a   : > { %949 = vmatpush1.msra.mxu0 %v875_v49  ;;  %1389 = vmatpush1.msra.mxu1 %v875_v49 }
 0x36b   : > { %1314 = vmatmul.mubr.msk.f32.vlgmr.msra.gmra.mxu0 %vm393_vm0, %v289_v50  ;;  %1316 = vmatmul.mubr.msk.f32.vlgmr.msra.gmra.mxu1 %vm393_vm0, %v291_v60 }
 0x36c   : > { %1000 = vmatprep.mubr.f32.mxu1 %v1636_v52  ;;  %988 = vmatprep.mubr.f32.mxu0 %v1636_v52 }
 0x36f   : > { %1317 = vmatmul.mubr.msk.f32.gmra.mxu1 %vm393_vm0, %v292_v36  ;;  %1315 = vmatmul.mubr.msk.f32.gmra.mxu0 %vm393_vm0, %v290_v43 }
 0x370   : > { %1006 = vmatprep.mubr.f32.mxu1 %v1636_v52 }
 0x373   : > { %1318 = vmatmul.mubr.msk.f32.gmra.mxu1 %vm393_vm0, %v293_v59 }
 0x374   : > { %1012 = vmatprep.mubr.f32.mxu1 %v1636_v52 }
 0x377   : > { %1319 = vmatmul.mubr.msk.f32.gmra.mxu1 %vm393_vm0, %v294_v63 }
 0x378   : > { %1018 = vmatprep.mubr.f32.mxu1 %v1636_v52 }
 0x37b   : > { %1320 = vmatmul.mubr.msk.f32.gmra.mxu1 %vm393_vm0, %v295_v5 }
 0x37c   : > { %1024 = vmatprep.mubr.f32.mxu1 %v1636_v52 }
 0x37f   : > { %1321 = vmatmul.mubr.msk.f32.gmra.mxu1 %vm393_vm0, %v296_v8 }
 0x380   : > { %1030 = vmatprep.mubr.f32.mxu1 %v1636_v52 }
 0x383   : > { %1322 = vmatmul.mubr.msk.f32.gmra.mxu1 %vm393_vm0, %v297_v34 }
 0x42b   : > { %v984_v10 = vpop.f32.mrf.mxu0  ;;  %v996_v6 = vpop.f32.mrf.mxu1 }
 0x42c   : > { %1072 = vrot.lane.b32.xlu1 %v984_v10, %s1637_s26 }
 0x42d   : > { %v986_v35 = vpop.f32.mrf.mxu0  ;;  %v998_v61 = vpop.f32.mrf.mxu1 }
 0x42e   : > { %1074 = vrot.lane.b32.xlu0 %v986_v35, %s1637_s26  ;;  %s1643_s26 = smov [#allocation5]  }
 0x42f   : > { %v1002_v7 = vpop.f32.mrf.mxu1  ;;  %v990_v12 = vpop.f32.mrf.mxu0 }
 0x430   : > { %1104 = vrot.lane.b32.xlu1 %v996_v6, %s1638_s29 }
 0x431   : > { %v1004_v11 = vpop.f32.mrf.mxu1  ;;  %v992_v15 = vpop.f32.mrf.mxu0 }
 0x432   : > { %1106 = vrot.lane.b32.xlu0 %v998_v61, %s1638_s29  ;;  %s1567_s29 = sshll.u32 %s1643_s26, 4  ;;  %s1568_s29 = int_to_ptr.vmem [resolvable:$false] %s1567_s29 }
 0x433   : > { %v1008_v52 = vpop.f32.mrf.mxu1 }
 0x434   : > { %1091 = vrot.lane.b32.xlu1 %v990_v12, %s1639_s9  ;;  %v1068_v31 = vadd.f32 %v1008_v52, %v302_v4 }
 0x435   : > { %v1010_v16 = vpop.f32.mrf.mxu1 }
 0x436   : > { %1093 = vrot.lane.b32.xlu0 %v992_v15, %s1639_s9  ;;  %v1069_v25 = vadd.f32 %v1010_v16, %v302_v4  ;;  %s1569_s9 = scalar_lea.vmem %s1568_s29, 512 }
 0x437   : > { %v1014_v19 = vpop.f32.mrf.mxu1 }
 0x438   : > { %1123 = vrot.lane.b32.xlu1 %v1002_v7, %s1632_s28 }
 0x439   : > { %v1016_v14 = vpop.f32.mrf.mxu1 }
 0x43a   : > { %1125 = vrot.lane.b32.xlu0 %v1004_v11, %s1632_s28  ;;  %s257_s28 = sand.u32 1, %s1619_s22  }
 0x43b   : > { %v1020_v0 = vpop.f32.mrf.mxu1  ;;  %s1196_s25 = scalar_lea.sflag [#allocation4], %s257_s28 }
 0x43c   : > { %1137 = vrot.lane.b32.xlu1 %v1014_v19, %s1634_s10 }
 0x43d   : > { %v1022_v1 = vpop.f32.mrf.mxu1 }
 0x43e   : > { %1139 = vrot.lane.b32.xlu0 %v1016_v14, %s1634_s10  ;;  %s1287_s10 = sshll.u32 %s257_s28, 4 }
 0x43f   : > { %v1026_v20 = vpop.f32.mrf.mxu1  ;;  %s259_s15 = scalar_lea.vmem [#allocation5], %s1287_s10 }
 0x440   : > { %1152 = vrot.lane.b32.xlu1 %v1020_v0, %s1640_s11  ;;  %s1210_s16 = sshll.u32 %s259_s15, 4  ;;  %s1211_s16 = int_to_ptr.vmem [resolvable:$true] %s1210_s16 }
 0x441   : > { %v1028_v21 = vpop.f32.mrf.mxu1  ;;  %s1563_s20 = scalar_lea.vmem %s1211_s16, 256  ;;  %p1570_p11 = scmp.lt.s32.totalorder %s1211_s16, %s1568_s29 }
 0x442   : > { %1154 = vrot.lane.b32.xlu0 %v1022_v1, %s1640_s11  ;;  %p1564_p6 = scmp.ne.s32.totalorder %s1211_s16, %s1563_s20  ;;  %p1571_p12 = scmp.lt.s32.totalorder %s1569_s9, %s1563_s20 }
 0x443   : > { %v1032_v24 = vpop.f32.mrf.mxu1 }
 0x444   : > { %1167 = vrot.lane.b32.xlu1 %v1026_v20, %s1641_s12  ;;  %p1565_p9 = pnand %p1564_p6, %p1717_p5  ;;  %p1572_p13 = por %p1571_p12, %p1570_p11 }
 0x445   : > { %v1034_v32 = vpop.f32.mrf.mxu1 }
 0x446   : > { %1169 = vrot.lane.b32.xlu0 %v1028_v21, %s1641_s12  ;;  %p1566_p10 = pneg %p1565_p9 }
 0x448   : > { %1180 = vrot.lane.b32.xlu1 %v1032_v24, %s1642_s13  ;;  %p1573_p0 = pnand %p1572_p13, %p1566_p10 }
 0x44a   : > { %1182 = vrot.lane.b32.xlu0 %v1034_v32, %s1642_s13 }
 0x49e   : > { %v1073_v37 = vpop.permute.xlu1 %1072 }
 0x49f   : > { %v1080_v39 = vsel %vm1076_vm2, 0.0, %v1073_v37 }
 0x4a0   : > { %v1075_v42 = vpop.permute.xlu0 %1074  ;;  %v1085_v30 = vsel %vm2120_vm3, %v1080_v39, 0.0 }
 0x4a1   : > { %v1077_v17 = vsel %vm1076_vm2, %v1073_v37, %v1075_v42  ;;  %v1087_v3 = vadd.f32 %v1085_v30, %v1068_v31 }
 0x4a2   : > { %v1105_v23 = vpop.permute.xlu1 %1104  ;;  %v1086_v18 = vsel %vm2124_vm4, %v1077_v17, 0.0 }
 0x4a3   : > { %v1088_v62 = vadd.f32 %v1086_v18, %v1069_v25  ;;  %v1112_v13 = vsel %vm1108_vm6, 0.0, %v1105_v23 }
 0x4a4   : > { %v1107_v41 = vpop.permute.xlu0 %1106  ;;  %v1117_v58 = vsel %vm2132_vm7, %v1112_v13, 0.0 }
 0x4a5   : > { %v1109_v45 = vsel %vm1108_vm6, %v1105_v23, %v1107_v41 }
 0x4a6   : > { %v1092_v48 = vpop.permute.xlu1 %1091  ;;  %v1118_v49 = vsel %vm2136_vm8, %v1109_v45, 0.0 }
 0x4a7   : > { %v1099_v28 = vsel %vm1095_vm5, 0.0, %v1092_v48 }
 0x4a8   : > { %v1094_v51 = vpop.permute.xlu0 %1093  ;;  %v1100_v26 = vadd.f32 %v1099_v28, %v1087_v3 }
 0x4a9   : > { %v1096_v2 = vsel %vm1095_vm5, %v1092_v48, %v1094_v51 }
 0x4aa   : > { %v1124_v29 = vpop.permute.xlu1 %1123  ;;  %v1101_v55 = vadd.f32 %v1096_v2, %v1088_v62  ;;  %v1119_v60 = vadd.f32 %v1117_v58, %v1100_v26 }
 0x4ab   : > { %v1130_v56 = vsel %vm384_vm1, 0.0, %v1124_v29 }
 0x4ac   : > { %v1126_v54 = vpop.permute.xlu0 %1125  ;;  %v1120_v36 = vadd.f32 %v1118_v49, %v1101_v55  ;;  %v1131_v63 = vsel %vm2120_vm3, %v1130_v56, 0.0 }
 0x4ad   : > { %v1127_v57 = vsel %vm384_vm1, %v1124_v29, %v1126_v54  ;;  %v1133_v35 = vadd.f32 %v1131_v63, %v1119_v60 }
 0x4ae   : > { %v1138_v44 = vpop.permute.xlu1 %1137  ;;  %v1132_v5 = vsel %vm2124_vm4, %v1127_v57, 0.0 }
 0x4af   : > { %v1134_v61 = vadd.f32 %v1132_v5, %v1120_v36 }
 0x4b0   : > { %v1140_v50 = vpop.permute.xlu0 %1139 }
 0x4b1   : > { %v1142_v43 = vsel %vm1141_vm9, %v1138_v44, %v1140_v50  ;;  %v1145_v59 = vsel %vm1141_vm9, %v1140_v50, 0.0 }
 0x4b2   : > { %v1153_v8 = vpop.permute.xlu1 %1152  ;;  %v1146_v34 = vsel %vm2132_vm7, %v1142_v43, 0.0  ;;  %v1147_v10 = vsel %vm2136_vm8, %v1145_v59, 0.0 }
 0x4b3   : > { %v1148_v16 = vadd.f32 %v1146_v34, %v1133_v35  ;;  %v1149_v19 = vadd.f32 %v1147_v10, %v1134_v61 }
 0x4b4   : > { %v1155_v6 = vpop.permute.xlu0 %1154 }
 0x4b5   : > { %v1157_v7 = vsel %vm1156_vm10, %v1153_v8, %v1155_v6  ;;  %v1160_v11 = vsel %vm1156_vm10, %v1155_v6, 0.0 }
 0x4b6   : > { %v1161_v12 = vsel %vm2120_vm3, %v1157_v7, 0.0  ;;  %v1162_v52 = vsel %vm2124_vm4, %v1160_v11, 0.0  ;;  %v1168_v15 = vpop.permute.xlu1 %1167 }
 0x4b7   : > { %v1163_v0 = vadd.f32 %v1161_v12, %v1148_v16  ;;  %v1164_v1 = vadd.f32 %v1162_v52, %v1149_v19 }
 0x4b8   : > { %v1170_v14 = vpop.permute.xlu0 %1169 }
 0x4b9   : > { %v1172_v20 = vsel %vm1171_vm11, %v1168_v15, %v1170_v14  ;;  %v1175_v21 = vsel %vm1171_vm11, %v1170_v14, 0.0 }
 0x4ba   : > { %v1181_v24 = vpop.permute.xlu1 %1180  ;;  %v1176_v33 = vadd.f32 %v1172_v20, %v1163_v0  ;;  %v1177_v38 = vadd.f32 %v1175_v21, %v1164_v1 }
 0x4bc   : > { %v1183_v32 = vpop.permute.xlu0 %1182 }
 0x4bd   : > { %v1185_v4 = vsel %vm1184_vm12, %v1181_v24, %v1183_v32  ;;  %v1188_v40 = vsel %vm1184_vm12, %v1183_v32, 0.0 }
 0x4be   : > { %v1189_v37 = vsel %vm2132_vm7, %v1185_v4, 0.0  ;;  %v1190_v42 = vsel %vm2136_vm8, %v1188_v40, 0.0 }
 0x4bf   : > { %v1191_v46 = vadd.f32 %v1189_v37, %v1176_v33  ;;  %v1192_v22 = vadd.f32 %v1190_v42, %v1177_v38 }
 0x4c1   : > { %1193 = vst [vmem:[%s259_s15] sm:$0xff] %v1191_v46  ;;  %1194 = vst [vmem:[%s259_s15 + $0x8] sm:$0xff] %v1192_v22 }
 0x4c2   : > { %1576 = shalt.err (!%p1573_p0)
}
 0x4c3   : > { %s1577_s11 = scalar_lea.hbm %s2169_s19, 256  ;;  %s1581_s28 = scalar_lea.hbm %s2212_s6, 512 }
 0x4c4   : > { %p1578_p1 = scmp.ne.s32.totalorder %s2169_s19, %s1577_s11  ;;  %p1582_p4 = scmp.lt.s32.totalorder %s2169_s19, %s2212_s6 }
 0x4c5   : > { %p1583_p7 = scmp.lt.s32.totalorder %s1581_s28, %s1577_s11 }
 0x4c6   : > { %p1579_p2 = pnand %p1578_p1, %p1717_p5 }
 0x4c7   : > { %p1584_p8 = por %p1583_p7, %p1582_p4 }
 0x4c8   : > { %p1580_p3 = pneg %p1579_p2 }
 0x4ca   : > { %p1585_p6 = pnand %p1584_p8, %p1580_p3 }
 0x4cc   : > { %1588 = shalt.err (!%p1585_p6)
}
 0x4cd   : > { %1394 = dma.vmem_to_hbm [thread:$0]  (%p1717_p5), %s1211_s16, 256, %s2169_s19, %s1196_s25  }
 0x4ce PF: > { %p1406_p9 = scmp.ge.s32.totalorder %s1627_s24, 2  ;;  %s1222_s15 = sand.u32 1, %s1615_s21  }
 0x4cf   : > { %p2224_p10 = scmp.ne.s32.totalorder %s2214_s8, 0  ;;  %s1223_s17 = scalar_lea.sflag [#allocation4], %s1222_s15 }
 0x4d1   : > { %p1401_p11 = pnand %p1406_p9, %p2224_p10 }
 0x4d3   : > { %p1402_p12 = pneg %p1401_p11 }
 0x4d5   : > { %1610 = dma.done.wait (%p1402_p12), %s1223_s17, 256  }
 0x4d6   : > { %1612 = vsyncadd (%p1402_p12), %s1223_s17, 4294967040  ;;  %p17_p13 = scmp.ge.s32.totalorder %s1704_s27, 4   ;;  %s2225_s21 = smov %s1619_s22 }
 0x4d7   : > { %s2226_s22 = smov %s1623_s23  ;;  %s2227_s23 = smov %s1715_s30 }
 0x4d8   : > { %s2228_s24 = smov %s1704_s27  ;;  %19 = sbr.rel (!%p17_p13) target bundleno = 4 (0x4), region = 84 }
 0x4dd   :  { %1228 = vsyncpa [#allocation3], 1 }
 0x4de   :  { %1230 = vsyncpa [#allocation3 + $0x1], 1 }
 0x4df   :  { %1231 = vsyncpa [#allocation4], 1 }
 0x4e0   :  { %1233 = vsyncpa [#allocation4 + $0x1], 1 }

</bundles_post_ra>
